<compile_context>
chip_gen: v6e
topology: v6e:2x2x1
jax: 0.10.0
libtpu: 0.0.40
codegen_flags: <defaults>
</compile_context>

<pallas_src>
import numpy as np

import jax
import jax.numpy as jnp
from jax.experimental import pallas as pl
from jax.experimental.pallas import tpu as pltpu


def _round_up(x, m):
    return (x + m - 1) // m * m


def _vlr_kernel_factory(Tc, Bt, H_pad, reverse, unroll, carry_in_vregs):
    """Recurrent kernel. Grid = (batch_tiles [parallel], time_blocks [arbitrary])."""

    def kernel(bs_ref,                       # scalar-prefetch: (T_pad,) int32 in SMEM
               g_ref, h0_ref, whh_ref,       # inputs: gates block, h0 tile, W_hh
               out_ref, hfin_ref,            # outputs: per-step hidden, final hidden
               h_scr):                       # VMEM scratch: carried hidden (Bt,H_pad) f32
        b_idx = pl.program_id(0)
        t_idx = pl.program_id(1)
        nblk = pl.num_programs(1)

        @pl.when(t_idx == 0)
        def _():
            h_scr[...] = h0_ref[...].astype(jnp.float32)

        # Base time index of this block within the (zero-padded) time axis.
        tblk = (nblk - 1 - t_idx) if reverse else t_idx
        t0 = tblk * Tc

        # Hoisted out of the inner time loop: global row ids and W_hh.
        row_id = b_idx * Bt + jax.lax.broadcasted_iota(jnp.int32, (Bt, 1), 0)
        whh = whh_ref[...]

        def step_body(s, h):
            local_t = (Tc - 1 - s) if reverse else s
            g_t = g_ref[local_t].astype(jnp.float32)          # (Bt, H_pad)
            # Only matmul left on the serial critical path: h @ W_hh (MXU, f32 acc).
            pre = g_t + jnp.dot(h.astype(whh.dtype), whh,
                                preferred_element_type=jnp.float32)
            h_new = jnp.tanh(pre)
            # Rows b >= batch_size_per_step[t] are padding at this time step:
            # keep their hidden frozen (== packed slicing / stash logic in torch).
            bs_t = bs_ref[t0 + local_t]
            h_upd = jnp.where(row_id < bs_t, h_new, h)
            out_ref[local_t] = h_upd.astype(out_ref.dtype)
            return h_upd

        if carry_in_vregs:
            # Hidden carried in vregs across the Tc steps; scratch written once.
            h_last = jax.lax.fori_loop(0, Tc, step_body, h_scr[...], unroll=unroll)
            h_scr[...] = h_last

            @pl.when(t_idx == nblk - 1)
            def _():
                hfin_ref[...] = h_last.astype(hfin_ref.dtype)
        else:
            # Large Bt*H_pad: keep the carry in VMEM scratch to avoid vreg spills.
            def step_scr(s, carry):
                h_scr[...] = step_body(s, h_scr[...])
                return carry

            jax.lax.fori_loop(0, Tc, step_scr, 0, unroll=unroll)

            @pl.when(t_idx == nblk - 1)
            def _():
                hfin_ref[...] = h_scr[...].astype(hfin_ref.dtype)

    return kernel


def variable_length_recurrent(x_packed, hidden, batch_size_per_step, params,
                              reverse=False, time_block=None, batch_block=None,
                              compute_dtype=None):
    """Pallas implementation of VariableLengthRecurrent.forward (tanh RNNCell).

    x_packed : (sum(batch_size_per_step), input_size)  -- PackedSequence rows
    hidden   : (B, H), B = batch_size_per_step[0]
    params   : (w_ih (I,H), w_hh (H,H), b_ih (1,H), b_hh (1,H))  -- pre-transposed
    Returns (final hidden (B, H), packed output (sum(bs), H)).
    """
    bs = [int(b) for b in batch_size_per_step]
    T = len(bs)
    B, H = hidden.shape
    assert bs[0] == B, "hidden must have batch_size_per_step[0] rows"
    # PackedSequence guarantees non-increasing step batch sizes; the frozen-row
    # masking relies on it.
    assert all(bs[t] >= bs[t + 1] for t in range(T - 1)), \
        "batch_size_per_step must be non-increasing"

    w_ih, w_hh, b_ih, b_hh = params
    out_dtype = x_packed.dtype
    cdt = jnp.dtype(compute_dtype) if compute_dtype is not None else jnp.dtype(out_dtype)
    csz = cdt.itemsize

    # Lane/sublane-aligned padded shapes (lane-dense stores, MXU-tileable matmul).
    sub = 16 if csz == 2 else 8
    B_pad = _round_up(B, sub)
    H_pad = _round_up(H, 128)

    # Batch tiling (v7x: shard independent rows across 2 TensorCores).
    if batch_block is None:
        Bt = B_pad
    else:
        Bt = min(_round_up(int(batch_block), sub), B_pad)
        B_pad = _round_up(B_pad, Bt)
    nb = B_pad // Bt

    # VMEM-budget-aware time block (amortize per-grid-step overhead; safe on v7x 64 MiB).
    def _pipeline_bytes(tc):
        return (2 * tc * Bt * H_pad * (csz + csz)      # gates in + out stream, double-buffered
                + 2 * H_pad * H_pad * csz              # W_hh (double-buffered by default)
                + 4 * Bt * H_pad * 4                   # h0 + final hidden (f32)
                + Bt * H_pad * 4)                      # f32 carry scratch

    if time_block is not None:
        Tc = int(time_block)
    else:
        Tc = min(T, 64)
        while Tc > 1 and _pipeline_bytes(Tc) > (40 << 20):
            Tc = max(1, Tc // 2)
    T_pad = _round_up(T, Tc)
    Tg = T_pad // Tc
    unroll = True if Tc < 32 else 8
    vmem_limit = int(min(64 << 20, max(32 << 20, _pipeline_bytes(Tc) + (8 << 20))))

    # Keep the hidden carry in vregs only while it fits comfortably (~32 vregs).
    carry_in_vregs = (Bt * H_pad * 4) <= 32 * 4096

    # --- static gather maps: packed rows <-> (time, batch)-padded slots ---------
    offsets = np.concatenate([[0], np.cumsum(bs[:-1])]).astype(np.int32)
    idx_pack = np.zeros((T_pad, B_pad), dtype=np.int32)        # padded slot -> packed row
    for t in range(T):
        idx_pack[t, :bs[t]] = offsets[t] + np.arange(bs[t], dtype=np.int32)
    idx_unpack = np.concatenate(                               # packed row -> padded slot
        [t * B_pad + np.arange(bs[t], dtype=np.int32) for t in range(T)])

    # --- hoisted input projection on PACKED rows (no FLOPs on padded slots) -----
    w_ih_p = jnp.pad(w_ih, ((0, 0), (0, H_pad - H))).astype(cdt)             # (I, H_pad)
    bias_p = jnp.pad((b_ih + b_hh).reshape(1, -1),
                     ((0, 0), (0, H_pad - H))).astype(jnp.float32)           # (1, H_pad)
    gates_packed = jnp.dot(x_packed.astype(cdt), w_ih_p,
                           preferred_element_type=jnp.float32) + bias_p      # (sum(bs), H_pad)
    gates = jnp.take(gates_packed.astype(cdt),
                     jnp.asarray(idx_pack.reshape(-1)), axis=0)
    gates = gates.reshape(T_pad, B_pad, H_pad)

    w_hh_p = jnp.pad(w_hh, ((0, H_pad - H), (0, H_pad - H))).astype(cdt)
    h0_p = jnp.pad(hidden.astype(jnp.float32), ((0, B_pad - B), (0, H_pad - H)))
    bs_arr = jnp.asarray(bs + [0] * (T_pad - T), dtype=jnp.int32)

    if reverse:
        tmap3 = lambda b, t, bs_ref: (Tg - 1 - t, b, 0)
    else:
        tmap3 = lambda b, t, bs_ref: (t, b, 0)
    bmap2 = lambda b, t, bs_ref: (b, 0)
    cmap2 = lambda b, t, bs_ref: (0, 0)

    out_padded, h_fin = pl.pallas_call(
        _vlr_kernel_factory(Tc, Bt, H_pad, reverse, unroll, carry_in_vregs),
        out_shape=(
            # per-step hidden stream in compute dtype (dominant HBM writeback)
            jax.ShapeDtypeStruct((T_pad, B_pad, H_pad), cdt),
            jax.ShapeDtypeStruct((B_pad, H_pad), jnp.float32),
        ),
        grid_spec=pltpu.PrefetchScalarGridSpec(
            num_scalar_prefetch=1,
            grid=(nb, Tg),
            in_specs=[
                pl.BlockSpec((Tc, Bt, H_pad), tmap3),      # precomputed gates block
                pl.BlockSpec((Bt, H_pad), bmap2),          # initial hidden tile
                pl.BlockSpec((H_pad, H_pad), cmap2),       # W_hh (resident)
            ],
            out_specs=[
                pl.BlockSpec((Tc, Bt, H_pad), tmap3),      # per-step hidden, lane-dense
                pl.BlockSpec((Bt, H_pad), bmap2),          # final hidden (resident)
            ],
            scratch_shapes=[pltpu.VMEM((Bt, H_pad), jnp.float32)],
        ),
        compiler_params=pltpu.CompilerParams(
            # batch tiles independent (megacore-shardable); time is a serial recurrence
            dimension_semantics=("parallel", "arbitrary"),
            vmem_limit_bytes=vmem_limit),
    )(bs_arr, gates, h0_p, w_hh_p)

    # --- repack per-step outputs into PackedSequence layout (single gather) -----
    out_flat = out_padded.reshape(T_pad * B_pad, H_pad)
    out_packed = jnp.take(out_flat, jnp.asarray(idx_unpack), axis=0)[:, :H]
    out_packed = out_packed.astype(out_dtype)
    h_fin = h_fin[:B, :H].astype(out_dtype)
    return h_fin, out_packed


# -------- pure-JAX reference: direct transcription of the PyTorch loop --------
def _cell_ref(x, h, w_ih, w_hh, b_ih, b_hh):
    return jnp.tanh(x @ w_ih + b_ih + h @ w_hh + b_hh)


def _vlr_reference(x, hidden, bs, params, reverse=False):
    w_ih, w_hh, b_ih, b_hh = params
    starting = bs[-1] if reverse else bs[0]
    output, hiddens = [], []
    input_offset = x.shape[0] if reverse else 0
    initial_hidden = hidden
    if reverse:
        hidden = hidden[:bs[-1]]
    last_bs = starting
    for i in range(len(bs)):
        if reverse:
            sbs = bs[-1 - i]
            step_input = x[input_offset - sbs:input_offset]
            input_offset -= sbs
        else:
            sbs = bs[i]
            step_input = x[input_offset:input_offset + sbs]
            input_offset += sbs
        new_pads = last_bs - sbs
        if new_pads > 0:
            hiddens.insert(0, hidden[-new_pads:])
            hidden = hidden[:-new_pads]
        if new_pads < 0:
            hidden = jnp.concatenate([hidden, initial_hidden[last_bs:sbs]], 0)
        last_bs = sbs
        hidden = _cell_ref(step_input, hidden, w_ih, w_hh, b_ih, b_hh)
        output.append(hidden)
    if not reverse:
        hiddens.insert(0, hidden)
        hidden = jnp.concatenate(hiddens, 0)
    if reverse:
        output = output[::-1]
    return hidden, jnp.concatenate(output, 0)


def _make_inputs(key, lengths, I, H, scale=0.1):
    k1, k2, k3, k4, k5, k6 = jax.random.split(key, 6)
    B = len(lengths)
    T = lengths[0]
    bs_per_step = [sum(1 for L in lengths if L > t) for t in range(T)]
    total = sum(bs_per_step)
    x_packed = jax.random.normal(k1, (total, I), jnp.float32)
    h0 = jax.random.normal(k2, (B, H), jnp.float32)
    w_ih = scale * jax.random.normal(k3, (I, H), jnp.float32)
    w_hh = scale * jax.random.normal(k4, (H, H), jnp.float32)
    b_ih = scale * jax.random.normal(k5, (1, H), jnp.float32)
    b_hh = scale * jax.random.normal(k6, (1, H), jnp.float32)
    return x_packed, h0, bs_per_step, (w_ih, w_hh, b_ih, b_hh)


if __name__ == "__main__":
    key = jax.random.PRNGKey(0)
    kA, kB = jax.random.split(key)

    # ---- small config: exercises multi-block time pipelining + time padding ----
    I, H = 16, 32
    lengths = [8, 6, 5, 3]                    # descending, PackedSequence convention
    x_packed, h0, bs_per_step, params = _make_inputs(kA, lengths, I, H)
    total = x_packed.shape[0]

    for reverse in (False, True):
        h_fin, out = variable_length_recurrent(
            x_packed, h0, bs_per_step, params, reverse=reverse, time_block=3)
        jax.block_until_ready((h_fin, out))
        h_exp, out_exp = _vlr_reference(x_packed, h0, bs_per_step, params, reverse=reverse)
        assert h_fin.shape == (bs_per_step[0], H)
        assert out.shape == (total, H)
        assert jnp.allclose(h_fin, h_exp, atol=1e-4, rtol=1e-4), \
            f"hidden mismatch (reverse={reverse})"
        assert jnp.allclose(out, out_exp, atol=1e-4, rtol=1e-4), \
            f"output mismatch (reverse={reverse})"

    # ---- bf16 compute path: bf16 projection/gates/W_hh/output stream, f32 carry ----
    h_fin, out = variable_length_recurrent(
        x_packed, h0, bs_per_step, params,
        reverse=False, time_block=4, compute_dtype=jnp.bfloat16)
    jax.block_until_ready((h_fin, out))
    h_exp, out_exp = _vlr_reference(x_packed, h0, bs_per_step, params, reverse=False)
    assert jnp.allclose(h_fin, h_exp, atol=2e-1, rtol=2e-1)
    assert jnp.allclose(out, out_exp, atol=2e-1, rtol=2e-1)

    # ---- larger batch: exercises the batch-tile grid axis (nb=2) + default Tc ----
    lengths2 = [10, 9, 9, 8, 7, 6, 5, 4, 3, 3, 2, 1]
    x2, h02, bs2, params2 = _make_inputs(kB, lengths2, I, H)
    for reverse in (False, True):
        h_fin, out = variable_length_recurrent(
            x2, h02, bs2, params2, reverse=reverse, batch_block=8)
        jax.block_until_ready((h_fin, out))
        h_exp, out_exp = _vlr_reference(x2, h02, bs2, params2, reverse=reverse)
        assert jnp.allclose(h_fin, h_exp, atol=1e-4, rtol=1e-4), \
            f"hidden mismatch (batch-tiled, reverse={reverse})"
        assert jnp.allclose(out, out_exp, atol=1e-4, rtol=1e-4), \
            f"output mismatch (batch-tiled, reverse={reverse})"

    print("KERNEL_OK")
</pallas_src>

<mosaic_0001>
module attributes {stable_mosaic.version = 11 : i64} {
  func.func @kernel(%arg0: i32, %arg1: i32, %arg2: memref<9xi32, #tpu.memory_space<smem>>, %arg3: memref<3x8x128xf32, #tpu.memory_space<vmem>>, %arg4: memref<8x128xf32, #tpu.memory_space<vmem>>, %arg5: memref<128x128xf32, #tpu.memory_space<vmem>>, %arg6: memref<3x8x128xf32, #tpu.memory_space<vmem>>, %arg7: memref<8x128xf32, #tpu.memory_space<vmem>>, %arg8: memref<8x128xf32, #tpu.memory_space<vmem>>) attributes {dimension_semantics = [#tpu.dimension_semantics<parallel>, #tpu.dimension_semantics<arbitrary>], iteration_bounds = array<i64: 1, 3>, scalar_prefetch = 1 : i64, scratch_operands = 1 : i64, tpu.core_type = #tpu.core_type<tc>, window_params = [{transform_indices = @transform_0, window_bounds = array<i64: 3, 8, 128>}, {transform_indices = @transform_1, window_bounds = array<i64: 8, 128>}, {pipeline_mode = #tpu.pipeline_mode<synchronous>, transform_indices = @transform_2, window_bounds = array<i64: 128, 128>}, {transform_indices = @transform_3, window_bounds = array<i64: 3, 8, 128>}, {transform_indices = @transform_4, window_bounds = array<i64: 8, 128>}]} {
    %c0_i32 = arith.constant 0 : i32
    %0 = arith.cmpi eq, %arg1, %c0_i32 : i32
    %1 = arith.extui %0 : i1 to i32
    %c0_i32_0 = arith.constant 0 : i32
    %2 = arith.cmpi ne, %1, %c0_i32_0 : i32
    scf.if %2 {
      %c0_24 = arith.constant 0 : index
      %c0_25 = arith.constant 0 : index
      %68 = vector.load %arg4[%c0_24, %c0_25] : memref<8x128xf32, #tpu.memory_space<vmem>>, vector<8x128xf32>
      %c0_26 = arith.constant 0 : index
      %c0_27 = arith.constant 0 : index
      %69 = vector.load %arg8[%c0_26, %c0_27] : memref<8x128xf32, #tpu.memory_space<vmem>>, vector<8x128xf32>
      tpu.vector_store %arg8[%c0_26, %c0_27], %68 {strides = array<i32>} : memref<8x128xf32, #tpu.memory_space<vmem>>, vector<8x128xf32>,
    } else {
    }
    %c3_i32 = arith.constant 3 : i32
    %3 = arith.muli %arg1, %c3_i32 : i32
    %c8_i32 = arith.constant 8 : i32
    %4 = arith.muli %arg0, %c8_i32 : i32
    %5 = tpu.iota {dimensions = array<i32: 0>} : vector<8x1xi32>
    %6 = vector.broadcast %4 : i32 to vector<8x1xi32>
    %7 = arith.addi %6, %5 : vector<8x1xi32>
    %c0 = arith.constant 0 : index
    %c0_1 = arith.constant 0 : index
    %8 = vector.load %arg5[%c0, %c0_1] : memref<128x128xf32, #tpu.memory_space<vmem>>, vector<128x128xf32>
    %c0_2 = arith.constant 0 : index
    %c0_3 = arith.constant 0 : index
    %9 = vector.load %arg8[%c0_2, %c0_3] : memref<8x128xf32, #tpu.memory_space<vmem>>, vector<8x128xf32>
    %c0_i32_4 = arith.constant 0 : i32
    %10 = arith.index_cast %c0_i32_4 : i32 to index
    %c0_5 = arith.constant 0 : index
    %c0_6 = arith.constant 0 : index
    %11 = vector.load %arg3[%10, %c0_5, %c0_6] : memref<3x8x128xf32, #tpu.memory_space<vmem>>, vector<1x8x128xf32>
    %12 = vector.shape_cast %11 : vector<1x8x128xf32> to vector<8x128xf32>
    %cst = arith.constant dense<0.000000e+00> : vector<8x128xf32>
    %13 = tpu.matmul %9, %8, %cst {dimension_numbers = #tpu.dot_dimension_numbers<[1], [0], [0], [1], [0, 0, 1, 1], [], []>} : vector<8x128xf32>, vector<128x128xf32>, vector<8x128xf32> -> vector<8x128xf32>
    %14 = arith.addf %12, %13 : vector<8x128xf32>
    %15 = math.tanh %14 : vector<8x128xf32>
    %16 = arith.addi %3, %c0_i32_4 : i32
    %17 = arith.index_cast %16 : i32 to index
    %18 = memref.load %arg2[%17] : memref<9xi32, #tpu.memory_space<smem>>
    %19 = vector.broadcast %18 : i32 to vector<8x1xi32>
    %20 = arith.cmpi slt, %7, %19 : vector<8x1xi32>
    %21 = vector.shape_cast %20 : vector<8x1xi1> to vector<8x1xi1>
    %22 = vector.broadcast %21 : vector<8x1xi1> to vector<8x128xi1>
    %23 = arith.select %22, %15, %9 : vector<8x128xi1>, vector<8x128xf32>
    %24 = arith.index_cast %c0_i32_4 : i32 to index
    %c0_7 = arith.constant 0 : index
    %c0_8 = arith.constant 0 : index
    %25 = vector.load %arg6[%24, %c0_7, %c0_8] : memref<3x8x128xf32, #tpu.memory_space<vmem>>, vector<1x8x128xf32>
    %26 = vector.shape_cast %25 : vector<1x8x128xf32> to vector<8x128xf32>
    %27 = vector.shape_cast %23 : vector<8x128xf32> to vector<1x8x128xf32>
    tpu.vector_store %arg6[%24, %c0_7, %c0_8], %27 {strides = array<i32>} : memref<3x8x128xf32, #tpu.memory_space<vmem>>, vector<1x8x128xf32>,
    %c1_i32 = arith.constant 1 : i32
    %28 = arith.index_cast %c1_i32 : i32 to index
    %c0_9 = arith.constant 0 : index
    %c0_10 = arith.constant 0 : index
    %29 = vector.load %arg3[%28, %c0_9, %c0_10] : memref<3x8x128xf32, #tpu.memory_space<vmem>>, vector<1x8x128xf32>
    %30 = vector.shape_cast %29 : vector<1x8x128xf32> to vector<8x128xf32>
    %cst_11 = arith.constant dense<0.000000e+00> : vector<8x128xf32>
    %31 = tpu.matmul %23, %8, %cst_11 {dimension_numbers = #tpu.dot_dimension_numbers<[1], [0], [0], [1], [0, 0, 1, 1], [], []>} : vector<8x128xf32>, vector<128x128xf32>, vector<8x128xf32> -> vector<8x128xf32>
    %32 = arith.addf %30, %31 : vector<8x128xf32>
    %33 = math.tanh %32 : vector<8x128xf32>
    %34 = arith.addi %3, %c1_i32 : i32
    %35 = arith.index_cast %34 : i32 to index
    %36 = memref.load %arg2[%35] : memref<9xi32, #tpu.memory_space<smem>>
    %37 = vector.broadcast %36 : i32 to vector<8x1xi32>
    %38 = arith.cmpi slt, %7, %37 : vector<8x1xi32>
    %39 = vector.shape_cast %38 : vector<8x1xi1> to vector<8x1xi1>
    %40 = vector.broadcast %39 : vector<8x1xi1> to vector<8x128xi1>
    %41 = arith.select %40, %33, %23 : vector<8x128xi1>, vector<8x128xf32>
    %42 = arith.index_cast %c1_i32 : i32 to index
    %c0_12 = arith.constant 0 : index
    %c0_13 = arith.constant 0 : index
    %43 = vector.load %arg6[%42, %c0_12, %c0_13] : memref<3x8x128xf32, #tpu.memory_space<vmem>>, vector<1x8x128xf32>
    %44 = vector.shape_cast %43 : vector<1x8x128xf32> to vector<8x128xf32>
    %45 = vector.shape_cast %41 : vector<8x128xf32> to vector<1x8x128xf32>
    tpu.vector_store %arg6[%42, %c0_12, %c0_13], %45 {strides = array<i32>} : memref<3x8x128xf32, #tpu.memory_space<vmem>>, vector<1x8x128xf32>,
    %c2_i32 = arith.constant 2 : i32
    %46 = arith.index_cast %c2_i32 : i32 to index
    %c0_14 = arith.constant 0 : index
    %c0_15 = arith.constant 0 : index
    %47 = vector.load %arg3[%46, %c0_14, %c0_15] : memref<3x8x128xf32, #tpu.memory_space<vmem>>, vector<1x8x128xf32>
    %48 = vector.shape_cast %47 : vector<1x8x128xf32> to vector<8x128xf32>
    %cst_16 = arith.constant dense<0.000000e+00> : vector<8x128xf32>
    %49 = tpu.matmul %41, %8, %cst_16 {dimension_numbers = #tpu.dot_dimension_numbers<[1], [0], [0], [1], [0, 0, 1, 1], [], []>} : vector<8x128xf32>, vector<128x128xf32>, vector<8x128xf32> -> vector<8x128xf32>
    %50 = arith.addf %48, %49 : vector<8x128xf32>
    %51 = math.tanh %50 : vector<8x128xf32>
    %52 = arith.addi %3, %c2_i32 : i32
    %53 = arith.index_cast %52 : i32 to index
    %54 = memref.load %arg2[%53] : memref<9xi32, #tpu.memory_space<smem>>
    %55 = vector.broadcast %54 : i32 to vector<8x1xi32>
    %56 = arith.cmpi slt, %7, %55 : vector<8x1xi32>
    %57 = vector.shape_cast %56 : vector<8x1xi1> to vector<8x1xi1>
    %58 = vector.broadcast %57 : vector<8x1xi1> to vector<8x128xi1>
    %59 = arith.select %58, %51, %41 : vector<8x128xi1>, vector<8x128xf32>
    %60 = arith.index_cast %c2_i32 : i32 to index
    %c0_17 = arith.constant 0 : index
    %c0_18 = arith.constant 0 : index
    %61 = vector.load %arg6[%60, %c0_17, %c0_18] : memref<3x8x128xf32, #tpu.memory_space<vmem>>, vector<1x8x128xf32>
    %62 = vector.shape_cast %61 : vector<1x8x128xf32> to vector<8x128xf32>
    %63 = vector.shape_cast %59 : vector<8x128xf32> to vector<1x8x128xf32>
    tpu.vector_store %arg6[%60, %c0_17, %c0_18], %63 {strides = array<i32>} : memref<3x8x128xf32, #tpu.memory_space<vmem>>, vector<1x8x128xf32>,
    %c3_i32_19 = arith.constant 3 : i32
    %c0_20 = arith.constant 0 : index
    %c0_21 = arith.constant 0 : index
    %64 = vector.load %arg8[%c0_20, %c0_21] : memref<8x128xf32, #tpu.memory_space<vmem>>, vector<8x128xf32>
    tpu.vector_store %arg8[%c0_20, %c0_21], %59 {strides = array<i32>} : memref<8x128xf32, #tpu.memory_space<vmem>>, vector<8x128xf32>,
    %c2_i32_22 = arith.constant 2 : i32
    %65 = arith.cmpi eq, %arg1, %c2_i32_22 : i32
    %66 = arith.extui %65 : i1 to i32
    %c0_i32_23 = arith.constant 0 : i32
    %67 = arith.cmpi ne, %66, %c0_i32_23 : i32
    scf.if %67 {
      %c0_24 = arith.constant 0 : index
      %c0_25 = arith.constant 0 : index
      %68 = vector.load %arg7[%c0_24, %c0_25] : memref<8x128xf32, #tpu.memory_space<vmem>>, vector<8x128xf32>
      tpu.vector_store %arg7[%c0_24, %c0_25], %59 {strides = array<i32>} : memref<8x128xf32, #tpu.memory_space<vmem>>, vector<8x128xf32>,
    } else {
    }
    return
  }
  func.func @transform_0(%arg0: i32, %arg1: i32, %arg2: memref<9xi32, #tpu.memory_space<smem>>) -> (i32, i32, i32) {
    %c0_i32 = arith.constant 0 : i32
    %c0_i32_0 = arith.constant 0 : i32
    return %arg1, %arg0, %c0_i32 : i32, i32, i32
  }
  func.func @transform_1(%arg0: i32, %arg1: i32, %arg2: memref<9xi32, #tpu.memory_space<smem>>) -> (i32, i32) {
    %c0_i32 = arith.constant 0 : i32
    %c0_i32_0 = arith.constant 0 : i32
    return %arg0, %c0_i32 : i32, i32
  }
  func.func @transform_2(%arg0: i32, %arg1: i32, %arg2: memref<9xi32, #tpu.memory_space<smem>>) -> (i32, i32) {
    %c0_i32 = arith.constant 0 : i32
    %c0_i32_0 = arith.constant 0 : i32
    %c0_i32_1 = arith.constant 0 : i32
    return %c0_i32, %c0_i32_0 : i32, i32
  }
  func.func @transform_3(%arg0: i32, %arg1: i32, %arg2: memref<9xi32, #tpu.memory_space<smem>>) -> (i32, i32, i32) {
    %c0_i32 = arith.constant 0 : i32
    %c0_i32_0 = arith.constant 0 : i32
    return %arg1, %arg0, %c0_i32 : i32, i32, i32
  }
  func.func @transform_4(%arg0: i32, %arg1: i32, %arg2: memref<9xi32, #tpu.memory_space<smem>>) -> (i32, i32) {
    %c0_i32 = arith.constant 0 : i32
    %c0_i32_0 = arith.constant 0 : i32
    return %arg0, %c0_i32 : i32, i32
  }
}

</mosaic_0001>

<bundles_post_ra>
// kernel: tpu_custom_call.1
= control target key start
LH: loop header
LB: loop body
LE: loop exit
PB: predicated region body
PF: predicated region fallthrough
CT: control target
= control target key end

     0   :  { %s1194_s18 = smov [#allocation4]   ;;  %s1572_s0 = inlined_call_operand.hbm [shape: s32[9], index: 0, kind: input, shape index: {}]   ;;  %s1573_s1 = inlined_call_operand.hbm [shape: f32[9,8,128], index: 1, kind: input, shape index: {}]   ;;  %s1574_s2 = inlined_call_operand.hbm [shape: f32[8,128], index: 2, kind: input, shape index: {}]   ;;  %s1575_s3 = inlined_call_operand.hbm [shape: f32[128,128], index: 3, kind: input, shape index: {}]   ;;  %s1576_s4 = inlined_call_operand.hbm [shape: f32[9,8,128], index: 4, kind: output, shape index: {0}]   ;;  %s1577_s5 = inlined_call_operand.hbm [shape: f32[8,128], index: 5, kind: output, shape index: {1}]  }
   0x1   :  { %1589 = sst [smem:[#allocation21_spill]] %s1574_s2 }
   0x2   :  { %12 = dma.hbm_to_smem %s1572_s0, 16, %s1194_s18, [#allocation3] }
   0x3   :  { %1152 = dma.done.wait [#allocation3], 16 }
   0x4   :  { %1153 = vsyncadd [#allocation3], 4294967280 }
   0x5   :  { %14 = sfence }
   0x6   :  { %15 = vsyncpa [#allocation6], 0 }
   0x7   :  { %17 = vsyncpa [#allocation6 + $0x1], 0 }
   0x8   :  { %18 = vsyncpa [#allocation9], 0 }
   0x9   :  { %19 = vsyncpa [#allocation7], 0 }
   0xa   :  { %21 = vsyncpa [#allocation7 + $0x1], 0 }
   0xb   :  { %22 = vsyncpa [#allocation13], 0  ;;  %s1239_s21 = smov 0   ;;  %s1241_s22 = smov 0  }
   0xc   :  { %s1243_s23 = smov 0   ;;  %s1245_s24 = smov 0  }
   0xd   :  { %s1247_s25 = smov 0   ;;  %s1249_s0 = smov 0  }
   0xe LB: > { %1590 = sst [smem:[#allocation19_spill]] %s1172_s21  ;;  %s706_s26 = sadd.s32 4294967295, %s1192_s0   ;;  %s1192_s0 = sphi %s1249_s0, %s28_s0   ;;  %s1188_s25 = sphi %s1247_s25, %s1618_s25   ;;  %s1184_s24 = sphi %s1245_s24, %s1617_s24   ;;  %s1180_s23 = sphi %s1243_s23, %s1616_s23   ;;  %s1176_s22 = sphi %s1241_s22, %s1615_s22   ;;  %s1172_s21 = sphi %s1239_s21, %s1614_s21  }
   0xf   : > { %s707_s27 = sadd.s32 4294967294, %s1192_s0   ;;  %p56_p0 = scmp.ne.s32.totalorder %s1180_s23, %s1176_s22 }
  0x10   : > { %p57_p1 = scmp.eq.s32.totalorder %s1192_s0, 0  ;;  %p62_p2 = scmp.ne.s32.totalorder %s1176_s22, %s1172_s21 }
  0x11   : > { %p1276_p3 = scmp.eq.s32.totalorder %s706_s26, 0  ;;  %p1280_p4 = scmp.eq.s32.totalorder %s706_s26, 2 }
  0x12   : > { %p1284_p5 = por %p57_p1, %p56_p0  ;;  %p141_p6 = scmp.eq.s32.totalorder %s707_s27, 2 }
  0x13   : > { %s1591_s28 = scalar_select %p1276_p3, 1, 0 }
  0x14   : > { %s1592_s29 = scalar_select %p1280_p4, 1, 0 }
  0x15   : > { %p1290_p7 = por %p1276_p3, %p62_p2  ;;  %p1296_p8 = por %p1280_p4, %p56_p0 }
  0x16   : > { %p1300_p9 = por %p141_p6, %p62_p2  ;;  %p708_p10 = scmp.ge.s32.totalorder %s1192_s0, 1 }
  0x17   : > { %s1594_s6 = scalar_select %p1290_p7, 1, 0 }
  0x18   : > { %s1595_s7 = scalar_select %p1296_p8, 1, 0 }
  0x19   : > { %s1596_s8 = scalar_select %p1300_p9, 1, 0 }
  0x1a   : > { %p174_p11 = scmp.lt.s32.totalorder %s1192_s0, 4  ;;  %s1195_s10 = smov [#allocation8]  }
  0x1b   : > { %1597 = sst [smem:[#allocation20_spill]] %s1596_s8  ;;  %s189_s11 = sshll.u32 %s1195_s10, 4  ;;  %s190_s11 = int_to_ptr.vmem [resolvable:$true] %s189_s11 }
  0x1c   : > { %p1306_p12 = pnand %p708_p10, %p174_p11  ;;  %p920_p13 = scmp.lt.s32.totalorder %s1192_s0, 3 }
  0x1d   : > { %s1196_s13 = smov [#allocation10]   ;;  %s1009_s16 = scalar_lea.vmem %s190_s11, 128 }
  0x1e   : > { %s1598_s9 = scalar_select %p1306_p12, 1, 0 }
  0x1f   : > { %p903_p0 = pneg %p1306_p12  ;;  %p1315_p1 = pnand %p920_p13, %p1284_p5 }
  0x20   : > { %s199_s14 = sshll.u32 %s1196_s13, 4  ;;  %p1010_p10 = scmp.ne.s32.totalorder %s190_s11, %s1009_s16  ;;  %s200_s14 = int_to_ptr.vmem [resolvable:$true] %s199_s14 }
  0x21   : > { %s1599_s12 = scalar_select %p1315_p1, 1, 0 }
  0x22   : > { %p1321_p2 = pnand %p903_p0, %p1276_p3  ;;  %p1017_p13 = scmp.lt.s32.totalorder %s190_s11, %s190_s11 }
  0x23   : > { %p1018_p9 = scmp.lt.s32.totalorder %s1009_s16, %s1009_s16 }
  0x24   : > { %p1000_p6 = pneg %p1321_p2 }
  0x25   : > { %p1019_p4 = por %p1018_p9, %p1017_p13 }
  0x26   : > { %p1012_p5 = pnand %p1010_p10, %p1000_p6 }
  0x28   : > { %p1013_p11 = pneg %p1012_p5 }
  0x2a   : > { %p1020_p8 = pnand %p1019_p4, %p1013_p11 }
  0x2c   : > { %1023 = shalt.err (!%p1020_p8)
}
  0x2d   : > { %s1601_s2 = sld [smem:[#allocation21_spill]]  ;;  %s1035_s19 = scalar_lea.vmem %s200_s14, 2048 }
  0x2e   : > { %p1036_p0 = scmp.ne.s32.totalorder %s200_s14, %s1035_s19  ;;  %p1043_p10 = scmp.lt.s32.totalorder %s200_s14, %s200_s14 }
  0x2f   : > { %p1044_p5 = scmp.lt.s32.totalorder %s1035_s19, %s1035_s19 }
  0x30   : > { %p1038_p3 = pnand %p1036_p0, %p1000_p6 }
  0x31   : > { %p1045_p12 = por %p1044_p5, %p1043_p10 }
  0x32   : > { %p1039_p7 = pneg %p1038_p3 }
  0x33   : > { %906 = dma.hbm_to_vmem [thread:$0]  (!%p1321_p2), %s1601_s2, 128, %s190_s11, [#allocation9]  }
  0x34   : > { %p1046_p1 = pnand %p1045_p12, %p1039_p7 }
  0x36   : > { %1049 = shalt.err (!%p1046_p1)
}
  0x37   : > { %s1588_s20 = smov 128   ;;  %s1198_s26 = smov 8  }
  0x38   : > { %909 = dma.hbm_to_vmem [thread:$0]  (!%p1321_p2), %s1575_s3, 2048, %s200_s14, [#allocation9], %s1588_s20, %s1588_s20, %s1198_s26  }
  0x39   : > { %s213_s10 = sand.u32 1, %s1180_s23   ;;  %s37_s13 = sadd.s32 1, %s1188_s25 }
  0x3a   : > { %s885_s16 = smul.u32 24, %s213_s10  ;;  %p38_p3 = scmp.ge.s32.totalorder %s37_s13, 3 }
  0x3b   : > { %s727_s17 = smul.u32 384, %s1188_s25  ;;  %s214_s14 = scalar_lea.sflag [#allocation6], %s213_s10 }
  0x3c   : > { %s1620_s13 = smov (%p38_p3, %s37_s13), 0  ;;  %s217_s2 = scalar_lea.vmem [#allocation5], %s885_s16 }
  0x3d   : > { %s224_s15 = scalar_lea.hbm %s1573_s1, %s727_s17  ;;  %s225_s8 = sshll.u32 %s217_s2, 4  ;;  %s226_s8 = int_to_ptr.vmem [resolvable:$true] %s225_s8 }
  0x3e   : > { %s44_s21 = ssub.s32 %s1188_s25, %s1620_s13  ;;  %p1603_p7 = scmp.ne.s32.totalorder %s1599_s12, 0 }
  0x3f   : > { %p1357_p4 = scmp.eq.s32.totalorder %s44_s21, 0  ;;  %s1063_s30 = scalar_lea.vmem %s226_s8, 384 }
  0x40   : > { %p1052_p8 = pneg %p1603_p7  ;;  %p1064_p9 = scmp.ne.s32.totalorder %s226_s8, %s1063_s30 }
  0x41   : > { %s1199_s11 = smov [#allocation5]  }
  0x42   : > { %p1066_p12 = pnand %p1064_p9, %p1052_p8  ;;  %s1068_s20 = sshll.u32 %s1199_s11, 4  ;;  %s1069_s20 = int_to_ptr.vmem [resolvable:$false] %s1068_s20 }
  0x43   : > { %s1070_s18 = scalar_lea.vmem %s1069_s20, 768  ;;  %p1071_p2 = scmp.lt.s32.totalorder %s226_s8, %s1069_s20 }
  0x44   : > { %p1067_p1 = pneg %p1066_p12  ;;  %p1072_p6 = scmp.lt.s32.totalorder %s1070_s18, %s1063_s30 }
  0x46   : > { %p1073_p11 = por %p1072_p6, %p1071_p2 }
  0x48   : > { %p1074_p13 = pnand %p1073_p11, %p1067_p1 }
  0x4a   : > { %1077 = shalt.err (!%p1074_p13)
}
  0x4b   : > { %s1604_s2 = smov 128   ;;  %s1605_s21 = sadd.s32 1, %s1180_s23 }
  0x4c   : > { %913 = dma.hbm_to_vmem [thread:$0]  (!%p1603_p7), %s224_s15, 384, %s226_s8, %s214_s14, %s1604_s2, %s1604_s2, %s1198_s26  }
  0x4d   : > { %s1373_s10 = scalar_select %p1357_p4, %s1180_s23, %s1605_s21  }
  0x4e   : > { %p1606_p0 = scmp.ne.s32.totalorder %s1598_s9, 0 }
  0x4f   : > { %s1378_s20 = sand.u32 (!%p1606_p0), 1, %s1176_s22   ;;  %p1607_p10 = scmp.ne.s32.totalorder (!%p1606_p0), %s1594_s6, 0 }
  0x50   : > { %237 = sbr.rel (%p1606_p0) target bundleno = 803 (0x323), region = 32  ;;  %s240_s11 = scalar_lea.sflag (!%p1606_p0), [#allocation6], %s1378_s20 }
  0x51   : > { %s886_s12 = smul.u32 (!%p1606_p0), 24, %s1378_s20 }
  0x53   : > { %s1382_s16 = scalar_lea.vmem (!%p1606_p0), [#allocation5], %s886_s12 }
  0x55   : > { %1155 = dma.done.wait (%p1607_p10), %s240_s11, 384  }
  0x56   : > { %1157 = vsyncadd (%p1607_p10), %s240_s11, 4294966912  ;;  %p1608_p5 = scmp.ne.s32.totalorder %s1591_s28, 0 }
  0x58   : > { %1159 = dma.done.wait (%p1608_p5), [#allocation9], 2176  }
  0x59   : > { %1161 = vsyncadd (%p1608_p5), [#allocation9], 4294965120  ;;  %s1392_s8 = scalar_lea.vmem [#allocation11], %s886_s12  ;;  %p716_p3 = scmp.ne.s32.totalorder %s1184_s24, 0 }
  0x5b   : > { %281 = sbr.rel (%p716_p3) target bundleno = 98 (0x62), region = 48 }
  0x60   : > { %v282_v0 = vld [vmem:[#allocation8] sm:$0xff] }
  0x61   : > { %283 = vst [vmem:[#allocation2] sm:$0xff] %v282_v0 }
  0x62 PF: > { %v1395_v1 = vld [vmem:[#allocation10 + $0x78] sm:$0xff]  ;;  %v1200_v2 = vmov 0.0   ;;  %v1398_v3 = vld [vmem:[#allocation10 + $0x70] sm:$0xff]  ;;  %vm1201_vm0 = vmmov 0   ;;  %v1405_v4 = vld [vmem:[#allocation10 + $0x68] sm:$0xff]  ;;  %s1496_s28 = smul.u32 3, %s1184_s24  ;;  %v286_v23 = vlaneseq }
  0x63   : > { %780 = vmatprep.subr.mxu0 %v1200_v2  ;;  %812 = vmatprep.mubr.msk.f32.mxu0 %vm1201_vm0, %v1200_v2  ;;  %v1411_v5 = vld [vmem:[#allocation10 + $0x60] sm:$0xff]  ;;  %v1417_v6 = vld [vmem:[#allocation10 + $0x58] sm:$0xff]  ;;  %v1423_v7 = vld [vmem:[#allocation10 + $0x50] sm:$0xff]  ;;  %p721_p4 = scmp.ne.s32.totalorder %s1184_s24, 2 }
  0x64   : > { %781 = vmatpush3.msra.mxu0 %v1395_v1  ;;  %815 = vmatprep.subr.mxu1 %v1200_v2  ;;  %v1429_v8 = vld [vmem:[#allocation10 + $0x48] sm:$0xff]  ;;  %v1435_v9 = vld [vmem:[#allocation10 + $0x40] sm:$0xff]  ;;  %v1441_v10 = vld [vmem:[#allocation10 + $0x38] sm:$0xff]  ;;  %s380_s6 = sld [smem:[#allocation4 + %s1496_s28]]  ;;  %v287_v24 = vshrl.u32 %v286_v23, 7  ;;  %s461_s9 = sadd.s32 1, %s1496_s28 }
  0x65   : > { %782 = vmatprep.subr.mxu0 %v1200_v2  ;;  %816 = vmatpush3.msra.mxu1 %v1395_v1  ;;  %v296_v11 = vld [vmem:[#allocation10 + $0x30] sm:$0xff]  ;;  %v295_v12 = vld [vmem:[#allocation10 + $0x28] sm:$0xff]  ;;  %v294_v13 = vld [vmem:[#allocation10 + $0x20] sm:$0xff]  ;;  %s462_s26 = sld [smem:[#allocation4 + %s461_s9]]  ;;  %s544_s17 = sadd.s32 2, %s1496_s28 }
  0x66   : > { %783 = vmatpush3.msra.mxu0 %v1398_v3  ;;  %817 = vmatprep.subr.mxu1 %v1200_v2  ;;  %v293_v14 = vld [vmem:[#allocation10 + $0x18] sm:$0xff]  ;;  %v292_v15 = vld [vmem:[#allocation10 + $0x10] sm:$0xff]  ;;  %v291_v16 = vld [vmem:[#allocation10 + $0x8] sm:$0xff]  ;;  %s545_s19 = sld [smem:[#allocation4 + %s544_s17]] }
  0x67   : > { %784 = vmatprep.subr.mxu0 %v1200_v2  ;;  %818 = vmatpush3.msra.mxu1 %v1398_v3  ;;  %v290_v17 = vld [vmem:[#allocation10] sm:$0xff]  ;;  %v717_v28 = vld [vmem:[%s1382_s16 + $0x8] sm:$0xff]  ;;  %v719_v35 = vld [vmem:[%s1382_s16 + $0x10] sm:$0xff] }
  0x68   : > { %785 = vmatpush3.msra.mxu0 %v1405_v4  ;;  %819 = vmatprep.subr.mxu1 %v1200_v2  ;;  %v306_v18 = vld [vmem:[#allocation2] sm:$0xff] }
  0x69   : > { %786 = vmatprep.subr.mxu0 %v1200_v2  ;;  %820 = vmatpush3.msra.mxu1 %v1405_v4  ;;  %v307_v19 = vld [vmem:[%s1382_s16] sm:$0xff] }
  0x6a   : > { %787 = vmatpush3.msra.mxu0 %v1411_v5  ;;  %821 = vmatprep.subr.mxu1 %v1200_v2  ;;  %v381_v25 = vstv %s380_s6 }
  0x6b   : > { %788 = vmatprep.subr.mxu0 %v1200_v2  ;;  %822 = vmatpush3.msra.mxu1 %v1411_v5  ;;  %vm382_vm1 = vcmp.lt.s32.totalorder %v287_v24, %v381_v25  ;;  %v463_v32 = vstv %s462_s26 }
  0x6c   : > { %789 = vmatpush3.msra.mxu0 %v1417_v6  ;;  %823 = vmatprep.subr.mxu1 %v1200_v2  ;;  %vm464_vm2 = vcmp.lt.s32.totalorder %v287_v24, %v463_v32  ;;  %v546_v39 = vstv %s545_s19 }
  0x6d   : > { %790 = vmatprep.subr.mxu0 %v1200_v2  ;;  %824 = vmatpush3.msra.mxu1 %v1417_v6  ;;  %vm547_vm3 = vcmp.lt.s32.totalorder %v287_v24, %v546_v39 }
  0x6e   : > { %791 = vmatpush3.msra.mxu0 %v1423_v7  ;;  %825 = vmatprep.subr.mxu1 %v1200_v2 }
  0x6f   : > { %792 = vmatprep.subr.mxu0 %v1200_v2  ;;  %826 = vmatpush3.msra.mxu1 %v1423_v7 }
  0x70   : > { %793 = vmatpush3.msra.mxu0 %v1429_v8  ;;  %827 = vmatprep.subr.mxu1 %v1200_v2 }
  0x71   : > { %794 = vmatprep.subr.mxu0 %v1200_v2  ;;  %828 = vmatpush3.msra.mxu1 %v1429_v8 }
  0x72   : > { %795 = vmatpush3.msra.mxu0 %v1435_v9  ;;  %829 = vmatprep.subr.mxu1 %v1200_v2 }
  0x73   : > { %796 = vmatprep.subr.mxu0 %v1200_v2  ;;  %830 = vmatpush3.msra.mxu1 %v1435_v9 }
  0x74   : > { %797 = vmatpush3.msra.mxu0 %v1441_v10  ;;  %831 = vmatprep.subr.mxu1 %v1200_v2 }
  0x75   : > { %798 = vmatprep.subr.mxu0 %v1200_v2  ;;  %832 = vmatpush3.msra.mxu1 %v1441_v10 }
  0x76   : > { %799 = vmatpush3.msra.mxu0 %v296_v11  ;;  %833 = vmatprep.subr.mxu1 %v1200_v2 }
  0x77   : > { %800 = vmatprep.subr.mxu0 %v1200_v2  ;;  %834 = vmatpush3.msra.mxu1 %v296_v11 }
  0x78   : > { %801 = vmatpush3.msra.mxu0 %v295_v12  ;;  %835 = vmatprep.subr.mxu1 %v1200_v2 }
  0x79   : > { %802 = vmatprep.subr.mxu0 %v1200_v2  ;;  %836 = vmatpush3.msra.mxu1 %v295_v12 }
  0x7a   : > { %803 = vmatpush3.msra.mxu0 %v294_v13  ;;  %837 = vmatprep.subr.mxu1 %v1200_v2 }
  0x7b   : > { %804 = vmatprep.subr.mxu0 %v1200_v2  ;;  %838 = vmatpush3.msra.mxu1 %v294_v13 }
  0x7c   : > { %805 = vmatpush3.msra.mxu0 %v293_v14  ;;  %839 = vmatprep.subr.mxu1 %v1200_v2 }
  0x7d   : > { %806 = vmatprep.subr.mxu0 %v1200_v2  ;;  %840 = vmatpush3.msra.mxu1 %v293_v14 }
  0x7e   : > { %807 = vmatpush3.msra.mxu0 %v292_v15  ;;  %841 = vmatprep.subr.mxu1 %v1200_v2 }
  0x7f   : > { %808 = vmatprep.subr.mxu0 %v1200_v2  ;;  %842 = vmatpush3.msra.mxu1 %v292_v15 }
  0x80   : > { %809 = vmatpush3.msra.mxu0 %v291_v16  ;;  %843 = vmatprep.subr.mxu1 %v1200_v2 }
  0x81   : > { %810 = vmatprep.subr.mxu0 %v1200_v2  ;;  %844 = vmatpush3.msra.mxu1 %v291_v16 }
  0x82   : > { %811 = vmatpush3.msra.mxu0 %v290_v17  ;;  %845 = vmatprep.subr.mxu1 %v1200_v2 }
  0x83   : > { %813 = vmatmul.mubr.f32.vlgmr.msra.gmra.mxu0 %v306_v18  ;;  %846 = vmatpush3.msra.mxu1 %v290_v17 }
  0x84   : > { %847 = vmatprep.mubr.msk.f32.mxu1 %vm1201_vm0, %v1200_v2  ;;  %850 = vmatprep.subr.mxu0 %v1200_v2 }
  0x85   : > { %851 = vmatpush3.msra.mxu0 %v1395_v1  ;;  %882 = vmatprep.mubr.msk.f32.mxu0 %vm1201_vm0, %v1200_v2 }
  0x86   : > { %852 = vmatprep.subr.mxu0 %v1200_v2 }
  0x87   : > { %853 = vmatpush3.msra.mxu0 %v1398_v3 }
  0x88   : > { %854 = vmatprep.subr.mxu0 %v1200_v2 }
  0x89   : > { %855 = vmatpush3.msra.mxu0 %v1405_v4 }
  0x8a   : > { %856 = vmatprep.subr.mxu0 %v1200_v2 }
  0x8b   : > { %857 = vmatpush3.msra.mxu0 %v1411_v5 }
  0x8c   : > { %858 = vmatprep.subr.mxu0 %v1200_v2 }
  0x8d   : > { %859 = vmatpush3.msra.mxu0 %v1417_v6 }
  0x8e   : > { %860 = vmatprep.subr.mxu0 %v1200_v2 }
  0x8f   : > { %861 = vmatpush3.msra.mxu0 %v1423_v7 }
  0x90   : > { %862 = vmatprep.subr.mxu0 %v1200_v2 }
  0x91   : > { %863 = vmatpush3.msra.mxu0 %v1429_v8 }
  0x92   : > { %864 = vmatprep.subr.mxu0 %v1200_v2 }
  0x93   : > { %865 = vmatpush3.msra.mxu0 %v1435_v9 }
  0x94   : > { %866 = vmatprep.subr.mxu0 %v1200_v2 }
  0x95   : > { %867 = vmatpush3.msra.mxu0 %v1441_v10 }
  0x96   : > { %868 = vmatprep.subr.mxu0 %v1200_v2 }
  0x97   : > { %869 = vmatpush3.msra.mxu0 %v296_v11 }
  0x98   : > { %870 = vmatprep.subr.mxu0 %v1200_v2 }
  0x99   : > { %871 = vmatpush3.msra.mxu0 %v295_v12 }
  0x9a   : > { %872 = vmatprep.subr.mxu0 %v1200_v2 }
  0x9b   : > { %873 = vmatpush3.msra.mxu0 %v294_v13 }
  0x9c   : > { %874 = vmatprep.subr.mxu0 %v1200_v2 }
  0x9d   : > { %875 = vmatpush3.msra.mxu0 %v293_v14 }
  0x9e   : > { %876 = vmatprep.subr.mxu0 %v1200_v2 }
  0x9f   : > { %877 = vmatpush3.msra.mxu0 %v292_v15 }
  0xa0   : > { %878 = vmatprep.subr.mxu0 %v1200_v2 }
  0xa1   : > { %879 = vmatpush3.msra.mxu0 %v291_v16 }
  0xa2   : > { %880 = vmatprep.subr.mxu0 %v1200_v2 }
  0xa3   : > { %881 = vmatpush3.msra.mxu0 %v290_v17 }
 0x143   : > { %v374_v20 = vpop.f32.mrf.mxu0 }
 0x144   : > { %v378_v21 = vadd.f32 %v374_v20, %v307_v19 }
 0x145   : > { %v814_v22 = vpop.f32.mrf.mxu0 }
 0x146   : > { %984 = vtanh.f32 %v378_v21 }
 0x153   : > { %v985_v26 = vpop.eup %984 }
 0x154   : > { %v385_v27 = vsel %vm382_vm1, %v985_v26, %v306_v18 }
 0x155   : > { %386 = vst [vmem:[%s1392_s8] sm:$0xff] %v385_v27  ;;  %848 = vmatmul.mubr.f32.vlgmr.msra.gmra.mxu1 %v385_v27 }
 0x215   : > { %v455_v29 = vpop.f32.mrf.mxu1 }
 0x216   : > { %v459_v30 = vadd.f32 %v717_v28, %v455_v29 }
 0x217   : > { %v849_v31 = vpop.f32.mrf.mxu1 }
 0x218   : > { %986 = vtanh.f32 %v459_v30 }
 0x225   : > { %v987_v33 = vpop.eup %986 }
 0x226   : > { %v467_v34 = vsel %vm464_vm2, %v987_v33, %v385_v27 }
 0x227   : > { %718 = vst [vmem:[%s1392_s8 + $0x8] sm:$0xff] %v467_v34  ;;  %883 = vmatmul.mubr.f32.vlgmr.msra.gmra.mxu0 %v467_v34 }
 0x2e7   : > { %v538_v36 = vpop.f32.mrf.mxu0 }
 0x2e8   : > { %v542_v37 = vadd.f32 %v719_v35, %v538_v36 }
 0x2e9   : > { %v884_v38 = vpop.f32.mrf.mxu0 }
 0x2ea   : > { %988 = vtanh.f32 %v542_v37 }
 0x2f5   : > { %557 = sbr.rel (%p721_p4) target bundleno = 763 (0x2fb), region = 52 }
 0x2f7   : > { %v989_v40 = vpop.eup %988 }
 0x2f8   : > { %v550_v41 = vsel %vm547_vm3, %v989_v40, %v467_v34 }
 0x2f9   : > { %720 = vst [vmem:[%s1392_s8 + $0x10] sm:$0xff] %v550_v41  ;;  %553 = vst [vmem:[#allocation2] sm:$0xff] %v550_v41 }
 0x2fa   : > { %558 = vst [vmem:[#allocation12] sm:$0xff] %v550_v41 }
 0x2fb PF: > { %s728_s15 = smul.u32 384, %s1184_s24  ;;  %s574_s27 = sshll.u32 %s1392_s8, 4  ;;  %s1514_s27 = int_to_ptr.vmem [resolvable:$true] %s574_s27 }
 0x2fc   : > { %s560_s2 = scalar_lea.sflag [#allocation7], %s1378_s20  ;;  %s1078_s21 = scalar_lea.vmem %s1514_s27, 384 }
 0x2fd   : > { %s1512_s18 = scalar_lea.hbm %s1576_s4, %s728_s15  ;;  %p1079_p7 = scmp.ne.s32.totalorder %s1514_s27, %s1078_s21 }
 0x2fe   : > { %p1609_p8 = scmp.ne.s32.totalorder %s1595_s7, 0  ;;  %s1202_s12 = smov [#allocation11]  }
 0x2ff   : > { %s1082_s11 = sshll.u32 %s1202_s12, 4  ;;  %s1083_s11 = int_to_ptr.vmem [resolvable:$false] %s1082_s11 }
 0x300   : > { %p1080_p9 = pnand %p1079_p7, %p1609_p8  ;;  %s1084_s24 = scalar_lea.vmem %s1083_s11, 768 }
 0x301   : > { %p1085_p1 = scmp.lt.s32.totalorder %s1514_s27, %s1083_s11  ;;  %p1086_p2 = scmp.lt.s32.totalorder %s1084_s24, %s1078_s21 }
 0x302   : > { %p1081_p12 = pneg %p1080_p9 }
 0x303   : > { %p1087_p6 = por %p1086_p2, %p1085_p1 }
 0x305   : > { %p1088_p11 = pnand %p1087_p6, %p1081_p12 }
 0x307   : > { %1091 = shalt.err (!%p1088_p11)
}
 0x308   : > { %s1092_s16 = scalar_lea.hbm %s1512_s18, 384  ;;  %s1096_s6 = scalar_lea.hbm %s1576_s4, 1152 }
 0x309   : > { %p1093_p13 = scmp.ne.s32.totalorder %s1512_s18, %s1092_s16  ;;  %p1097_p5 = scmp.lt.s32.totalorder %s1512_s18, %s1576_s4 }
 0x30a   : > { %p1098_p3 = scmp.lt.s32.totalorder %s1096_s6, %s1092_s16 }
 0x30b   : > { %p1094_p0 = pnand %p1093_p13, %p1609_p8 }
 0x30c   : > { %p1099_p4 = por %p1098_p3, %p1097_p5 }
 0x30d   : > { %p1095_p10 = pneg %p1094_p0 }
 0x30f   : > { %p1100_p7 = pnand %p1099_p4, %p1095_p10 }
 0x311   : > { %1103 = shalt.err (!%p1100_p7)
}
 0x312   : > { %s1203_s17 = smov 128   ;;  %s1204_s19 = smov 8  }
 0x313   : > { %897 = dma.vmem_to_hbm [thread:$0]  (%p1609_p8), %s1514_s27, 384, %s1512_s18, %s560_s2, %s1203_s17, %s1203_s17, %s1204_s19  }
 0x314   : > { %s1205_s15 = smov [#allocation12]   ;;  %p1610_p12 = scmp.ne.s32.totalorder %s1592_s29, 0 }
 0x315   : > { %s590_s14 = sshll.u32 %s1205_s15, 4  ;;  %s591_s14 = int_to_ptr.vmem [resolvable:$true] %s590_s14 }
 0x316   : > { %s1104_s30 = scalar_lea.vmem %s591_s14, 128  ;;  %p1111_p6 = scmp.lt.s32.totalorder %s591_s14, %s591_s14 }
 0x317   : > { %p1105_p9 = scmp.ne.s32.totalorder %s591_s14, %s1104_s30  ;;  %p1112_p11 = scmp.lt.s32.totalorder %s1104_s30, %s1104_s30 }
 0x319   : > { %p1106_p1 = pnand %p1105_p9, %p1610_p12  ;;  %p1113_p13 = por %p1112_p11, %p1111_p6 }
 0x31b   : > { %p1107_p2 = pneg %p1106_p1 }
 0x31d   : > { %p1114_p0 = pnand %p1113_p13, %p1107_p2 }
 0x31f   : > { %1117 = shalt.err (!%p1114_p0)
}
 0x320   : > { %899 = dma.vmem_to_hbm [thread:$0]  (%p1610_p12), %s591_s14, 128, %s1577_s5, [#allocation13]  }
 0x321   : > { %1163 = dma.done.wait (%p1610_p12), [#allocation13], 128  }
 0x322   : > { %1165 = vsyncadd (%p1610_p12), [#allocation13], 4294967168 }
 0x323 PF: > { %s1611_s7 = sld [smem:[#allocation19_spill]]  ;;  %p925_p8 = scmp.ge.s32.totalorder %s1192_s0, 2 }
 0x324   : > { %s1612_s20 = sld [smem:[#allocation20_spill]] }
 0x329   : > { %s606_s27 = sand.u32 1, %s1611_s7  }
 0x32a   : > { %p1613_p10 = scmp.ne.s32.totalorder %s1612_s20, 0  ;;  %s607_s18 = scalar_lea.sflag [#allocation7], %s606_s27 }
 0x32c   : > { %p915_p5 = pnand %p925_p8, %p1613_p10 }
 0x32e   : > { %p916_p3 = pneg %p915_p5 }
 0x330   : > { %1167 = dma.done.wait (%p916_p3), %s607_s18, 384  }
 0x331   : > { %1169 = vsyncadd (%p916_p3), %s607_s18, 4294966912  ;;  %s28_s0 = sadd.s32 1, %s1192_s0   ;;  %s1614_s21 = smov %s1176_s22 }
 0x332   : > { %p25_p4 = scmp.ge.s32.totalorder %s28_s0, 5   ;;  %s1615_s22 = smov %s1180_s23 }
 0x333   : > { %s1616_s23 = smov %s1373_s10  ;;  %s1617_s24 = smov %s1188_s25 }
 0x334   : > { %s1618_s25 = smov %s1620_s13  ;;  %27 = sbr.rel (!%p25_p4) target bundleno = 14 (0xe), region = 107 }
 0x339   :  { %612 = vsyncpa [#allocation6], 1 }
 0x33a   :  { %614 = vsyncpa [#allocation6 + $0x1], 1 }
 0x33b   :  { %615 = vsyncpa [#allocation9], 1 }
 0x33c   :  { %616 = vsyncpa [#allocation7], 1 }
 0x33d   :  { %618 = vsyncpa [#allocation7 + $0x1], 1 }
 0x33e   :  { %619 = vsyncpa [#allocation13], 1 }

</bundles_post_ra>
